<compile_context>
chip_gen: v7x
topology: tpu7x:2x2x1
jax: 0.10.0
libtpu: 0.0.40
codegen_flags: <defaults>
</compile_context>

<pallas_src>
import functools

import jax
import jax.numpy as jnp
from jax.experimental import pallas as pl
from jax.experimental.pallas import tpu as pltpu

LANE = 128
MXU_TILE = 512          # multiple of 256 (v6e/v7x MXU width); ~85% HBM roofline


def _round_up(x, m):
    return (x + m - 1) // m * m


# ---------------------------------------------------------------------------
# Fused single-call kernel for small graphs (everything resident in VMEM)
# ---------------------------------------------------------------------------
def _fused_small_kernel(a_ref, x_ref, w1_ref, w2_ref, o_ref):
    bf16, f32 = jnp.bfloat16, jnp.float32
    xw1 = jnp.dot(x_ref[...], w1_ref[...], preferred_element_type=f32).astype(bf16)
    h1 = jnp.maximum(
        jnp.dot(a_ref[...], xw1, preferred_element_type=f32), 0.0).astype(bf16)
    xw2 = jnp.dot(h1, w2_ref[...], preferred_element_type=f32).astype(bf16)
    o_ref[...] = jnp.dot(a_ref[...], xw2,
                         preferred_element_type=f32).astype(o_ref.dtype)


def _fused_small(a_p, x_p, w1t, w2t):
    n_pad = a_p.shape[0]
    f_pad, h_pad = w1t.shape
    c_pad = w2t.shape[1]
    cost = pl.CostEstimate(
        flops=2 * n_pad * (f_pad * h_pad + n_pad * h_pad
                           + h_pad * c_pad + n_pad * c_pad),
        transcendentals=0,
        bytes_accessed=(a_p.size + x_p.size + w1t.size + w2t.size) * 2
        + n_pad * c_pad * 4,
    )
    return pl.pallas_call(
        _fused_small_kernel,
        out_shape=jax.ShapeDtypeStruct((n_pad, c_pad), jnp.float32),
        compiler_params=pltpu.CompilerParams(vmem_limit_bytes=48 << 20),
        cost_estimate=cost,
    )(a_p, x_p, w1t, w2t)


# ---------------------------------------------------------------------------
# Tiled kernels (larger graphs)
# ---------------------------------------------------------------------------
def _linear_kernel(x_ref, w_ref, o_ref):
    """o = x @ w, with w already in (in_features, out_features) layout."""
    o_ref[...] = jnp.dot(x_ref[...], w_ref[...],
                         preferred_element_type=jnp.float32).astype(o_ref.dtype)


def _agg_kernel(a_ref, h_ref, o_ref, acc_ref, *, tk, apply_relu):
    """o[row_tile] = (relu?)( sum_k A[row_tile, k_tile] @ H[k_tile] ).
    H is fully resident in VMEM; the k-th tile is sliced in-kernel."""
    k = pl.program_id(1)

    @pl.when(k == 0)
    def _():
        acc_ref[...] = jnp.zeros_like(acc_ref)

    start = pl.multiple_of(k * tk, tk)
    acc_ref[...] += jnp.dot(a_ref[...], h_ref[pl.ds(start, tk), :],
                            preferred_element_type=jnp.float32)

    @pl.when(k == pl.num_programs(1) - 1)
    def _():
        r = acc_ref[...]
        if apply_relu:
            r = jnp.maximum(r, 0.0)
        o_ref[...] = r.astype(o_ref.dtype)


def _agg_linear_kernel(a_ref, h_ref, w_ref, o_ref, acc_ref, *, tk):
    """o[row_tile] = relu( sum_k A[row_tile, k_tile] @ H[k_tile] ) @ W.
    Second GCN layer's linear fused into the finalize branch."""
    k = pl.program_id(1)

    @pl.when(k == 0)
    def _():
        acc_ref[...] = jnp.zeros_like(acc_ref)

    start = pl.multiple_of(k * tk, tk)
    acc_ref[...] += jnp.dot(a_ref[...], h_ref[pl.ds(start, tk), :],
                            preferred_element_type=jnp.float32)

    @pl.when(k == pl.num_programs(1) - 1)
    def _():
        h1 = jnp.maximum(acc_ref[...], 0.0).astype(jnp.bfloat16)
        o_ref[...] = jnp.dot(h1, w_ref[...],
                             preferred_element_type=jnp.float32).astype(o_ref.dtype)


# ---------------------------------------------------------------------------
# pallas_call wrappers (tiled path)
# ---------------------------------------------------------------------------
def _tiled_vmem_limit(n_pad, tm, tk, fdim, cdim, out_bytes):
    """Explicit scoped-VMEM budget (double-buffered A/out, resident H/W, acc)."""
    need = (2 * tm * tk * 2            # A tiles, double-buffered bf16
            + 2 * n_pad * fdim * 2     # resident H (budget 2 buffers)
            + 2 * fdim * cdim * 2      # resident epilogue weight
            + 2 * tm * cdim * out_bytes
            + tm * fdim * 4)           # f32 accumulator scratch
    # v7x physical VMEM is 64 MiB per TensorCore -> cap well below it.
    return min(int(need * 1.5) + (4 << 20), 48 << 20)


def _linear(x_p, w_p, tm, *, vmem_limit, out_dtype=jnp.bfloat16):
    """(n_pad, f_in) bf16 @ (f_in, f_out) bf16 -> (n_pad, f_out)."""
    n_pad, f_in = x_p.shape
    f_out = w_p.shape[1]
    cost = pl.CostEstimate(
        flops=2 * n_pad * f_in * f_out,
        transcendentals=0,
        bytes_accessed=(n_pad * f_in + f_in * f_out) * 2
        + n_pad * f_out * jnp.dtype(out_dtype).itemsize,
    )
    return pl.pallas_call(
        _linear_kernel,
        out_shape=jax.ShapeDtypeStruct((n_pad, f_out), out_dtype),
        grid_spec=pltpu.PrefetchScalarGridSpec(
            num_scalar_prefetch=0,
            grid=(n_pad // tm,),
            in_specs=[
                pl.BlockSpec((tm, f_in), lambda i: (i, 0)),
                pl.BlockSpec((f_in, f_out), lambda i: (0, 0)),   # weight resident
            ],
            out_specs=pl.BlockSpec((tm, f_out), lambda i: (i, 0)),
        ),
        compiler_params=pltpu.CompilerParams(
            dimension_semantics=("parallel",), vmem_limit_bytes=vmem_limit),
        cost_estimate=cost,
    )(x_p, w_p)


def _aggregate(a_p, h_p, *, tm, tk, apply_relu, out_dtype, vmem_limit):
    """A (n_pad,n_pad) bf16 @ H (n_pad,fdim) bf16, H fully VMEM-resident."""
    n_pad = a_p.shape[0]
    fdim = h_p.shape[1]
    cost = pl.CostEstimate(
        flops=2 * n_pad * n_pad * fdim,
        transcendentals=0,
        bytes_accessed=n_pad * n_pad * 2 + n_pad * fdim * 2
        + n_pad * fdim * jnp.dtype(out_dtype).itemsize,
    )
    return pl.pallas_call(
        functools.partial(_agg_kernel, tk=tk, apply_relu=apply_relu),
        out_shape=jax.ShapeDtypeStruct((n_pad, fdim), out_dtype),
        grid_spec=pltpu.PrefetchScalarGridSpec(
            num_scalar_prefetch=0,
            grid=(n_pad // tm, n_pad // tk),
            in_specs=[
                pl.BlockSpec((tm, tk), lambda i, k: (i, k)),        # A streamed
                pl.BlockSpec((n_pad, fdim), lambda i, k: (0, 0)),   # H resident
            ],
            out_specs=pl.BlockSpec((tm, fdim), lambda i, k: (i, 0)),
            scratch_shapes=[pltpu.VMEM((tm, fdim), jnp.float32)],
        ),
        compiler_params=pltpu.CompilerParams(
            dimension_semantics=("parallel", "arbitrary"),
            vmem_limit_bytes=vmem_limit),
        cost_estimate=cost,
    )(a_p, h_p)


def _aggregate_linear(a_p, h_p, w_p, *, tm, tk, out_dtype, vmem_limit):
    """relu(A @ H) @ W with the linear fused into the accumulator finalize."""
    n_pad = a_p.shape[0]
    fdim = h_p.shape[1]
    cdim = w_p.shape[1]
    cost = pl.CostEstimate(
        flops=2 * n_pad * n_pad * fdim + 2 * n_pad * fdim * cdim,
        transcendentals=0,
        bytes_accessed=n_pad * n_pad * 2 + n_pad * fdim * 2 + fdim * cdim * 2
        + n_pad * cdim * jnp.dtype(out_dtype).itemsize,
    )
    return pl.pallas_call(
        functools.partial(_agg_linear_kernel, tk=tk),
        out_shape=jax.ShapeDtypeStruct((n_pad, cdim), out_dtype),
        grid_spec=pltpu.PrefetchScalarGridSpec(
            num_scalar_prefetch=0,
            grid=(n_pad // tm, n_pad // tk),
            in_specs=[
                pl.BlockSpec((tm, tk), lambda i, k: (i, k)),        # A streamed
                pl.BlockSpec((n_pad, fdim), lambda i, k: (0, 0)),   # H resident
                pl.BlockSpec((fdim, cdim), lambda i, k: (0, 0)),    # W2 resident
            ],
            out_specs=pl.BlockSpec((tm, cdim), lambda i, k: (i, 0)),
            scratch_shapes=[pltpu.VMEM((tm, fdim), jnp.float32)],
        ),
        compiler_params=pltpu.CompilerParams(
            dimension_semantics=("parallel", "arbitrary"),
            vmem_limit_bytes=vmem_limit),
        cost_estimate=cost,
    )(a_p, h_p, w_p)


# ---------------------------------------------------------------------------
# Forward pass
# ---------------------------------------------------------------------------
def build_adjacency(edge_index, edge_weight, n, n_pad=None):
    """Dense A[dst, src] = sum of edge weights (duplicates summed), f32."""
    n_pad = n if n_pad is None else n_pad
    src, dst = edge_index[0], edge_index[1]
    return jnp.zeros((n_pad, n_pad), jnp.float32).at[dst, src].add(edge_weight)


@functools.partial(jax.jit, static_argnames=("fused_threshold",))
def gcn_test_v2_forward(x, edge_index, edge_weight, w1, w2, *, fused_threshold=2048):
    """x: (N, nfeat) f32; edge_index: (2, E) i32 [src; dst]; edge_weight: (E,) f32.
    w1: (nhid, nfeat), w2: (nclass, nhid) in torch Linear layout."""
    n, nfeat = x.shape
    nhid, nclass = w1.shape[0], w2.shape[0]

    f_pad = _round_up(nfeat, LANE)
    h_pad = _round_up(nhid, LANE)
    c_pad = _round_up(nclass, LANE)
    bf16 = jnp.bfloat16

    use_fused = _round_up(n, LANE) <= fused_threshold
    n_pad = _round_up(n, LANE) if use_fused else _round_up(n, MXU_TILE)

    # Adjacency build stays XLA glue (scatter-add in f32, then bf16 for MXU).
    a_p = build_adjacency(edge_index, edge_weight, n, n_pad).astype(bf16)
    x_p = jnp.zeros((n_pad, f_pad), bf16).at[:n, :nfeat].set(x.astype(bf16))
    # Weights pre-transposed ONCE to (in, out) -> kernels are plain NN matmuls.
    w1t = jnp.zeros((f_pad, h_pad), bf16).at[:nfeat, :nhid].set(w1.T.astype(bf16))
    w2t = jnp.zeros((h_pad, c_pad), bf16).at[:nhid, :nclass].set(w2.T.astype(bf16))

    if use_fused:
        out = _fused_small(a_p, x_p, w1t, w2t)
    else:
        tm = tk = MXU_TILE
        if n_pad // tm < 2:          # keep both v7x TensorCores busy
            tm = n_pad // 2
        # xw1 = X @ W1.T
        xw1 = _linear(
            x_p, w1t, tm,
            vmem_limit=_tiled_vmem_limit(n_pad, tm, tm, f_pad, h_pad, 2))
        # xw2 = relu(A @ xw1) @ W2.T   (second linear fused into epilogue)
        xw2 = _aggregate_linear(
            a_p, xw1, w2t, tm=tm, tk=tk, out_dtype=bf16,
            vmem_limit=_tiled_vmem_limit(n_pad, tm, tk, h_pad, c_pad, 2))
        # out = A @ xw2
        out = _aggregate(
            a_p, xw2, tm=tm, tk=tk, apply_relu=False, out_dtype=jnp.float32,
            vmem_limit=_tiled_vmem_limit(n_pad, tm, tk, c_pad, c_pad, 4))
    return out[:n, :nclass]


# ---------------------------------------------------------------------------
# References
# ---------------------------------------------------------------------------
def reference_forward_f32(x, edge_index, edge_weight, w1, w2):
    n = x.shape[0]
    a = build_adjacency(edge_index, edge_weight, n)
    h1 = jnp.maximum(a @ (x @ w1.T), 0.0)
    return a @ (h1 @ w2.T)


def reference_forward_mixed(x, edge_index, edge_weight, w1, w2):
    """Emulates the kernel's bf16-operand / f32-accumulate numerics."""
    f32, bf16 = jnp.float32, jnp.bfloat16
    n = x.shape[0]
    a = build_adjacency(edge_index, edge_weight, n).astype(bf16).astype(f32)
    xb = x.astype(bf16).astype(f32)
    w1b = w1.astype(bf16).astype(f32)
    w2b = w2.astype(bf16).astype(f32)
    xw1 = (xb @ w1b.T).astype(bf16).astype(f32)
    h1 = jnp.maximum(a @ xw1, 0.0).astype(bf16).astype(f32)
    xw2 = (h1 @ w2b.T).astype(bf16).astype(f32)
    return a @ xw2


if __name__ == "__main__":
    key = jax.random.PRNGKey(0)
    k_x, k_w1, k_w2, k_e, k_ew, k_x2, k_e2, k_ew2 = jax.random.split(key, 8)

    # ---- small graph: fused single-call path ----
    N, NFEAT, NHID, NCLASS, E = 64, 32, 32, 16, 256
    x = jax.random.normal(k_x, (N, NFEAT), dtype=jnp.float32)
    w1 = jax.random.normal(k_w1, (NHID, NFEAT), dtype=jnp.float32) / jnp.sqrt(NFEAT)
    w2 = jax.random.normal(k_w2, (NCLASS, NHID), dtype=jnp.float32) / jnp.sqrt(NHID)
    edge_index = jax.random.randint(k_e, (2, E), 0, N, dtype=jnp.int32)
    edge_weight = jax.random.uniform(k_ew, (E,), dtype=jnp.float32)

    out = jax.block_until_ready(
        gcn_test_v2_forward(x, edge_index, edge_weight, w1, w2))
    assert out.shape == (N, NCLASS)

    ref_mixed = reference_forward_mixed(x, edge_index, edge_weight, w1, w2)
    diff_mixed = float(jnp.max(jnp.abs(out - ref_mixed)))
    assert jnp.allclose(out, ref_mixed, atol=1e-2, rtol=1e-2), diff_mixed

    ref_f32 = reference_forward_f32(x, edge_index, edge_weight, w1, w2)
    diff_f32 = float(jnp.max(jnp.abs(out - ref_f32)))
    assert jnp.allclose(out, ref_f32, atol=1e-1, rtol=1e-1), diff_f32

    # ---- larger graph: tiled path (forced by fused_threshold=0) ----
    N2, E2 = 1300, 8192
    x2 = jax.random.normal(k_x2, (N2, NFEAT), dtype=jnp.float32)
    edge_index2 = jax.random.randint(k_e2, (2, E2), 0, N2, dtype=jnp.int32)
    edge_weight2 = jax.random.uniform(k_ew2, (E2,), dtype=jnp.float32)

    out2 = jax.block_until_ready(
        gcn_test_v2_forward(x2, edge_index2, edge_weight2, w1, w2,
                            fused_threshold=0))
    assert out2.shape == (N2, NCLASS)
    ref2 = reference_forward_mixed(x2, edge_index2, edge_weight2, w1, w2)
    diff2 = float(jnp.max(jnp.abs(out2 - ref2)))
    assert jnp.allclose(out2, ref2, atol=3e-2, rtol=3e-2), diff2

    print("KERNEL_OK")
</pallas_src>

<mosaic_0001>
module attributes {stable_mosaic.version = 11 : i64} {
  func.func private @main(%arg0: i32) attributes {dimension_semantics = [#tpu.dimension_semantics<core_parallel>], iteration_bounds = array<i64: 2>, tpu.core_type = #tpu.core_type<sc_scalar_subcore>, window_params = []} {
    return
  }
}

module attributes {stable_mosaic.version = 11 : i64} {
  func.func private @main(%arg0: i32) attributes {dimension_semantics = [#tpu.dimension_semantics<core_parallel>], iteration_bounds = array<i64: 2>, tpu.core_type = #tpu.core_type<sc_scalar_subcore>, window_params = []} {
    return
  }
}

module attributes {stable_mosaic.version = 11 : i64} {
  func.func @_fused_small_kernel(%arg0: memref<128x128xbf16, #tpu.memory_space<vmem>>, %arg1: memref<128x128xbf16, #tpu.memory_space<vmem>>, %arg2: memref<128x128xbf16, #tpu.memory_space<vmem>>, %arg3: memref<128x128xbf16, #tpu.memory_space<vmem>>, %arg4: memref<128x128xf32, #tpu.memory_space<vmem>>) attributes {dimension_semantics = [], scalar_prefetch = 0 : i64, scratch_operands = 0 : i64, tpu.core_type = #tpu.core_type<tc>} {
    %c0 = arith.constant 0 : index
    %c0_0 = arith.constant 0 : index
    %0 = vector.load %arg1[%c0, %c0_0] : memref<128x128xbf16, #tpu.memory_space<vmem>>, vector<128x128xbf16>
    %c0_1 = arith.constant 0 : index
    %c0_2 = arith.constant 0 : index
    %1 = vector.load %arg2[%c0_1, %c0_2] : memref<128x128xbf16, #tpu.memory_space<vmem>>, vector<128x128xbf16>
    %cst = arith.constant dense<0.000000e+00> : vector<128x128xf32>
    %2 = tpu.matmul %0, %1, %cst {dimension_numbers = #tpu.dot_dimension_numbers<[1], [0], [0], [1], [0, 0, 1, 1], [], []>} : vector<128x128xbf16>, vector<128x128xbf16>, vector<128x128xf32> -> vector<128x128xf32>
    %3 = arith.truncf %2 : vector<128x128xf32> to vector<128x128xbf16>
    %c0_3 = arith.constant 0 : index
    %c0_4 = arith.constant 0 : index
    %4 = vector.load %arg0[%c0_3, %c0_4] : memref<128x128xbf16, #tpu.memory_space<vmem>>, vector<128x128xbf16>
    %cst_5 = arith.constant dense<0.000000e+00> : vector<128x128xf32>
    %5 = tpu.matmul %4, %3, %cst_5 {dimension_numbers = #tpu.dot_dimension_numbers<[1], [0], [0], [1], [0, 0, 1, 1], [], []>} : vector<128x128xbf16>, vector<128x128xbf16>, vector<128x128xf32> -> vector<128x128xf32>
    %cst_6 = arith.constant 0.000000e+00 : f32
    %6 = vector.broadcast %cst_6 : f32 to vector<128x128xf32>
    %7 = arith.maximumf %5, %6 : vector<128x128xf32>
    %8 = arith.truncf %7 : vector<128x128xf32> to vector<128x128xbf16>
    %c0_7 = arith.constant 0 : index
    %c0_8 = arith.constant 0 : index
    %9 = vector.load %arg3[%c0_7, %c0_8] : memref<128x128xbf16, #tpu.memory_space<vmem>>, vector<128x128xbf16>
    %cst_9 = arith.constant dense<0.000000e+00> : vector<128x128xf32>
    %10 = tpu.matmul %8, %9, %cst_9 {dimension_numbers = #tpu.dot_dimension_numbers<[1], [0], [0], [1], [0, 0, 1, 1], [], []>} : vector<128x128xbf16>, vector<128x128xbf16>, vector<128x128xf32> -> vector<128x128xf32>
    %11 = arith.truncf %10 : vector<128x128xf32> to vector<128x128xbf16>
    %c0_10 = arith.constant 0 : index
    %c0_11 = arith.constant 0 : index
    %12 = vector.load %arg0[%c0_10, %c0_11] : memref<128x128xbf16, #tpu.memory_space<vmem>>, vector<128x128xbf16>
    %cst_12 = arith.constant dense<0.000000e+00> : vector<128x128xf32>
    %13 = tpu.matmul %12, %11, %cst_12 {dimension_numbers = #tpu.dot_dimension_numbers<[1], [0], [0], [1], [0, 0, 1, 1], [], []>} : vector<128x128xbf16>, vector<128x128xbf16>, vector<128x128xf32> -> vector<128x128xf32>
    %c0_13 = arith.constant 0 : index
    %c0_14 = arith.constant 0 : index
    %14 = vector.load %arg4[%c0_13, %c0_14] : memref<128x128xf32, #tpu.memory_space<vmem>>, vector<128x128xf32>
    tpu.vector_store %arg4[%c0_13, %c0_14], %13 {strides = array<i32>} : memref<128x128xf32, #tpu.memory_space<vmem>>, vector<128x128xf32>,
    return
  }
}

</mosaic_0001>

<bundles_post_ra>
// kernel: gcn_test_v2_forward.1
= control target key start
LH: loop header
LB: loop body
LE: loop exit
PB: predicated region body
PF: predicated region fallthrough
CT: control target
= control target key end

     0   :  { %s1179_s2 = inlined_call_operand.vmem [shape: bf16[128,128], index: 2, kind: input, shape index: {}]   ;;  %s1180_s1 = inlined_call_operand.vmem [shape: bf16[128,128], index: 1, kind: input, shape index: {}]   ;;  %s1181_s0 = inlined_call_operand.vmem [shape: bf16[128,128], index: 0, kind: input, shape index: {}]   ;;  %s1182_s3 = inlined_call_operand.vmem [shape: bf16[128,128], index: 3, kind: input, shape index: {}]   ;;  %s1183_s4 = inlined_call_operand.vmem [shape: f32[128,128], index: 4, kind: output, shape index: {}]  }
   0x1   :  { %v946_v0 = vld [vmem:[%s1179_s2] sm:$0xff]   ;;  %v947_v1 = vld [vmem:[%s1179_s2 + $0x8] sm:$0xff]   ;;  %v948_v2 = vld [vmem:[%s1179_s2 + $0x10] sm:$0xff]  }
   0x2   :  { %818 = vmatprep.subr.bf16.mxu0 %v946_v0  ;;  %v949_v3 = vld [vmem:[%s1179_s2 + $0x18] sm:$0xff]   ;;  %v954_v4 = vld [vmem:[%s1180_s1] sm:$0xff]   ;;  %v951_v6 = vld [vmem:[%s1179_s2 + $0x28] sm:$0xff]  }
   0x3   :  { %819 = vmatpush3.bf16.msra.mxu0 %v946_v0  ;;  %834 = vmatprep.mubr.bf16.mxu0 %v954_v4  ;;  %v950_v5 = vld [vmem:[%s1179_s2 + $0x20] sm:$0xff]   ;;  %v952_v7 = vld [vmem:[%s1179_s2 + $0x30] sm:$0xff]   ;;  %v953_v8 = vld [vmem:[%s1179_s2 + $0x38] sm:$0xff]  }
   0x4   :  { %820 = vmatprep.subr.bf16.mxu0 %v947_v1  ;;  %v955_v9 = vld [vmem:[%s1180_s1 + $0x8] sm:$0xff]   ;;  %v956_v10 = vld [vmem:[%s1180_s1 + $0x10] sm:$0xff]   ;;  %v957_v11 = vld [vmem:[%s1180_s1 + $0x18] sm:$0xff]  }
   0x5   :  { %v958_v12 = vld [vmem:[%s1180_s1 + $0x20] sm:$0xff]   ;;  %v959_v13 = vld [vmem:[%s1180_s1 + $0x28] sm:$0xff]   ;;  %v960_v14 = vld [vmem:[%s1180_s1 + $0x30] sm:$0xff]  }
   0x6   :  { %v961_v15 = vld [vmem:[%s1180_s1 + $0x38] sm:$0xff]   ;;  %v1054_v16 = vld [vmem:[%s1181_s0] sm:$0xff]   ;;  %v971_v18 = vld [vmem:[%s1182_s3 + $0x8] sm:$0xff]  }
   0x7   :  { %821 = vmatpush3.bf16.msra.mxu0 %v947_v1  ;;  %866 = vmatprep.mubr.bf16.mxu1 %v1054_v16  ;;  %v970_v17 = vld [vmem:[%s1182_s3] sm:$0xff]   ;;  %v972_v19 = vld [vmem:[%s1182_s3 + $0x10] sm:$0xff]   ;;  %v973_v20 = vld [vmem:[%s1182_s3 + $0x18] sm:$0xff]  }
   0x8   :  { %822 = vmatprep.subr.bf16.mxu0 %v948_v2  ;;  %v974_v21 = vld [vmem:[%s1182_s3 + $0x20] sm:$0xff]   ;;  %v975_v22 = vld [vmem:[%s1182_s3 + $0x28] sm:$0xff]   ;;  %v1083_v48 = vld [vmem:[%s1181_s0 + $0x10] sm:$0xff]  }
   0x9   :  { %v1078_v47 = vld [vmem:[%s1181_s0 + $0x8] sm:$0xff]   ;;  %v1090_v49 = vld [vmem:[%s1181_s0 + $0x18] sm:$0xff]   ;;  %v1095_v50 = vld [vmem:[%s1181_s0 + $0x20] sm:$0xff]  }
   0xa   :  { %v1102_v51 = vld [vmem:[%s1181_s0 + $0x28] sm:$0xff]   ;;  %v1107_v52 = vld [vmem:[%s1181_s0 + $0x30] sm:$0xff]   ;;  %v1114_v53 = vld [vmem:[%s1181_s0 + $0x38] sm:$0xff]  }
   0xb   :  { %823 = vmatpush3.bf16.msra.mxu0 %v948_v2  ;;  %v976_v54 = vld [vmem:[%s1182_s3 + $0x30] sm:$0xff]   ;;  %v977_v55 = vld [vmem:[%s1182_s3 + $0x38] sm:$0xff]  }
   0xc   :  { %824 = vmatprep.subr.bf16.mxu0 %v949_v3 }
   0xf   :  { %825 = vmatpush3.bf16.msra.mxu0 %v949_v3 }
  0x10   :  { %826 = vmatprep.subr.bf16.mxu0 %v950_v5 }
  0x13   :  { %827 = vmatpush3.bf16.msra.mxu0 %v950_v5 }
  0x14   :  { %828 = vmatprep.subr.bf16.mxu0 %v951_v6 }
  0x17   :  { %829 = vmatpush3.bf16.msra.mxu0 %v951_v6 }
  0x18   :  { %830 = vmatprep.subr.bf16.mxu0 %v952_v7 }
  0x1b   :  { %831 = vmatpush3.bf16.msra.mxu0 %v952_v7 }
  0x1c   :  { %832 = vmatprep.subr.bf16.mxu0 %v953_v8 }
  0x1f   :  { %833 = vmatpush3.bf16.msra.mxu0 %v953_v8 }
  0x20   :  { %882 = vmatprep.subr.bf16.mxu0 %v970_v17 }
  0x22   :  { %835 = vmatmul.mubr.bf16.vlgmr.msra.gmra.mrb[0].mxu0 %v955_v9 }
  0x23   :  { %838 = vmatprep.mubr.bf16.mxu0 %v956_v10  ;;  %883 = vmatpush3.bf16.msra.mxu0 %v970_v17 }
  0x24   :  { %884 = vmatprep.subr.bf16.mxu0 %v971_v18 }
  0x27   :  { %885 = vmatpush3.bf16.msra.mxu0 %v971_v18 }
  0x28   :  { %886 = vmatprep.subr.bf16.mxu0 %v972_v19 }
  0x2a   :  { %839 = vmatmul.mubr.bf16.gmra.mrb[4].mxu0 %v957_v11 }
  0x2b   :  { %842 = vmatprep.mubr.bf16.mxu0 %v958_v12  ;;  %887 = vmatpush3.bf16.msra.mxu0 %v972_v19 }
  0x2c   :  { %888 = vmatprep.subr.bf16.mxu0 %v973_v20 }
  0x2f   :  { %889 = vmatpush3.bf16.msra.mxu0 %v973_v20 }
  0x30   :  { %890 = vmatprep.subr.bf16.mxu0 %v974_v21 }
  0x32   :  { %843 = vmatmul.mubr.bf16.gmra.mrb[8].mxu0 %v959_v13 }
  0x33   :  { %846 = vmatprep.mubr.bf16.mxu0 %v960_v14  ;;  %891 = vmatpush3.bf16.msra.mxu0 %v974_v21 }
  0x34   :  { %892 = vmatprep.subr.bf16.mxu0 %v975_v22 }
  0x37   :  { %893 = vmatpush3.bf16.msra.mxu0 %v975_v22 }
  0x38   :  { %894 = vmatprep.subr.bf16.mxu0 %v976_v54 }
  0x3a   :  { %847 = vmatmul.mubr.bf16.gmra.mrb[12].mxu0 %v961_v15 }
  0x3b   :  { %895 = vmatpush3.bf16.msra.mxu0 %v976_v54 }
  0x3c   :  { %896 = vmatprep.subr.bf16.mxu0 %v977_v55 }
  0x3f   :  { %897 = vmatpush3.bf16.msra.mxu0 %v977_v55 }
  0xf5   :  { %v836_v23 = vpop.f32.mrb[0].mxu0 }
  0xf6   :  { %v180_v24 = vpop.f32.mrb[1].mxu0 }
  0xf7   :  { %v837_v25 = vpop.f32.mrb[2].mxu0 }
  0xf8   :  { %v244_v26 = vpack.c.bf16 %v837_v25, %v836_v23  ;;  %v183_v27 = vpop.f32.mrb[3].mxu0 }
  0xf9   :  { %v243_v28 = vpack.c.bf16 %v183_v27, %v180_v24 }
  0xfb   :  { %850 = vmatprep.subr.bf16.mxu1 %v243_v28 }
  0xfc   :  { %851 = vmatpush3.bf16.msra.mxu1 %v243_v28 }
  0xfd   :  { %v840_v29 = vpop.f32.mrb[4].mxu0  ;;  %852 = vmatprep.subr.bf16.mxu1 %v244_v26 }
  0xfe   :  { %v196_v30 = vpop.f32.mrb[5].mxu0 }
  0xff   :  { %v841_v31 = vpop.f32.mrb[6].mxu0 }
 0x100   :  { %v246_v32 = vpack.c.bf16 %v841_v31, %v840_v29  ;;  %v199_v33 = vpop.f32.mrb[7].mxu0  ;;  %853 = vmatpush3.bf16.msra.mxu1 %v244_v26 }
 0x101   :  { %v245_v34 = vpack.c.bf16 %v199_v33, %v196_v30 }
 0x103   :  { %854 = vmatprep.subr.bf16.mxu1 %v245_v34 }
 0x104   :  { %855 = vmatpush3.bf16.msra.mxu1 %v245_v34 }
 0x105   :  { %v844_v35 = vpop.f32.mrb[8].mxu0  ;;  %856 = vmatprep.subr.bf16.mxu1 %v246_v32 }
 0x106   :  { %v212_v36 = vpop.f32.mrb[9].mxu0 }
 0x107   :  { %v845_v37 = vpop.f32.mrb[10].mxu0 }
 0x108   :  { %v248_v38 = vpack.c.bf16 %v845_v37, %v844_v35  ;;  %v215_v39 = vpop.f32.mrb[11].mxu0  ;;  %857 = vmatpush3.bf16.msra.mxu1 %v246_v32 }
 0x109   :  { %v247_v40 = vpack.c.bf16 %v215_v39, %v212_v36 }
 0x10b   :  { %858 = vmatprep.subr.bf16.mxu1 %v247_v40 }
 0x10c   :  { %859 = vmatpush3.bf16.msra.mxu1 %v247_v40 }
 0x10d   :  { %v848_v41 = vpop.f32.mrb[12].mxu0  ;;  %860 = vmatprep.subr.bf16.mxu1 %v248_v38 }
 0x10e   :  { %v228_v42 = vpop.f32.mrb[13].mxu0 }
 0x10f   :  { %v849_v43 = vpop.f32.mrb[14].mxu0 }
 0x110   :  { %v250_v44 = vpack.c.bf16 %v849_v43, %v848_v41  ;;  %v231_v45 = vpop.f32.mrb[15].mxu0  ;;  %861 = vmatpush3.bf16.msra.mxu1 %v248_v38 }
 0x111   :  { %v249_v46 = vpack.c.bf16 %v231_v45, %v228_v42 }
 0x113   :  { %862 = vmatprep.subr.bf16.mxu1 %v249_v46 }
 0x114   :  { %863 = vmatpush3.bf16.msra.mxu1 %v249_v46 }
 0x115   :  { %864 = vmatprep.subr.bf16.mxu1 %v250_v44 }
 0x118   :  { %865 = vmatpush3.bf16.msra.mxu1 %v250_v44 }
 0x11b   :  { %867 = vmatmul.mubr.bf16.vlgmr.msra.gmra.mrb[0].mxu1 %v1078_v47 }
 0x11c   :  { %870 = vmatprep.mubr.bf16.mxu1 %v1083_v48 }
 0x123   :  { %871 = vmatmul.mubr.bf16.gmra.mrb[4].mxu1 %v1090_v49 }
 0x124   :  { %874 = vmatprep.mubr.bf16.mxu1 %v1095_v50 }
 0x12b   :  { %875 = vmatmul.mubr.bf16.gmra.mrb[8].mxu1 %v1102_v51 }
 0x12c   :  { %878 = vmatprep.mubr.bf16.mxu1 %v1107_v52 }
 0x133   :  { %879 = vmatmul.mubr.bf16.gmra.mrb[12].mxu1 %v1114_v53 }
 0x134   :  { %930 = vmatprep.mubr.bf16.mxu1 %v1054_v16 }
 0x1ee   :  { %v868_v56 = vpop.f32.mrb[0].mxu1 }
 0x1ef   :  { %v349_v57 = vpop.f32.mrb[1].mxu1  ;;  %v414_v59 = vmax.f32 %v868_v56, 0.0 }
 0x1f0   :  { %v869_v58 = vpop.f32.mrb[2].mxu1  ;;  %v412_v62 = vmax.f32 %v349_v57, 0.0 }
 0x1f1   :  { %v415_v60 = vmax.f32 %v869_v58, 0.0  ;;  %v352_v61 = vpop.f32.mrb[3].mxu1 }
 0x1f2   :  { %v413_v63 = vmax.f32 %v352_v61, 0.0 }
 0x1f3   :  { %v429_v0 = vpack.c.bf16 %v415_v60, %v414_v59 }
 0x1f4   :  { %v428_v1 = vpack.c.bf16 %v413_v63, %v412_v62 }
 0x1f6   :  { %v872_v2 = vpop.f32.mrb[4].mxu1  ;;  %898 = vmatprep.mubr.bf16.mxu0 %v428_v1 }
 0x1f7   :  { %v365_v3 = vpop.f32.mrb[5].mxu1  ;;  %899 = vmatmul.mubr.bf16.vlgmr.msra.gmra.mrb[16].mxu0 %v429_v0  ;;  %v418_v5 = vmax.f32 %v872_v2, 0.0 }
 0x1f8   :  { %v873_v4 = vpop.f32.mrb[6].mxu1  ;;  %v416_v8 = vmax.f32 %v365_v3, 0.0 }
 0x1f9   :  { %v419_v6 = vmax.f32 %v873_v4, 0.0  ;;  %v368_v7 = vpop.f32.mrb[7].mxu1 }
 0x1fa   :  { %v417_v9 = vmax.f32 %v368_v7, 0.0 }
 0x1fb   :  { %v431_v10 = vpack.c.bf16 %v419_v6, %v418_v5 }
 0x1fc   :  { %v430_v11 = vpack.c.bf16 %v417_v9, %v416_v8 }
 0x1fe   :  { %v876_v12 = vpop.f32.mrb[8].mxu1  ;;  %902 = vmatprep.mubr.bf16.mxu0 %v430_v11 }
 0x1ff   :  { %v381_v13 = vpop.f32.mrb[9].mxu1  ;;  %903 = vmatmul.mubr.bf16.gmra.mrb[20].mxu0 %v431_v10  ;;  %v422_v15 = vmax.f32 %v876_v12, 0.0 }
 0x200   :  { %v877_v14 = vpop.f32.mrb[10].mxu1  ;;  %v420_v18 = vmax.f32 %v381_v13, 0.0 }
 0x201   :  { %v423_v16 = vmax.f32 %v877_v14, 0.0  ;;  %v384_v17 = vpop.f32.mrb[11].mxu1 }
 0x202   :  { %v421_v19 = vmax.f32 %v384_v17, 0.0 }
 0x203   :  { %v433_v20 = vpack.c.bf16 %v423_v16, %v422_v15 }
 0x204   :  { %v432_v21 = vpack.c.bf16 %v421_v19, %v420_v18 }
 0x206   :  { %v880_v22 = vpop.f32.mrb[12].mxu1  ;;  %906 = vmatprep.mubr.bf16.mxu0 %v432_v21 }
 0x207   :  { %v397_v23 = vpop.f32.mrb[13].mxu1  ;;  %907 = vmatmul.mubr.bf16.gmra.mrb[24].mxu0 %v433_v20  ;;  %v426_v25 = vmax.f32 %v880_v22, 0.0 }
 0x208   :  { %v881_v24 = vpop.f32.mrb[14].mxu1  ;;  %v424_v28 = vmax.f32 %v397_v23, 0.0 }
 0x209   :  { %v427_v26 = vmax.f32 %v881_v24, 0.0  ;;  %v400_v27 = vpop.f32.mrb[15].mxu1 }
 0x20a   :  { %v425_v29 = vmax.f32 %v400_v27, 0.0 }
 0x20b   :  { %v435_v30 = vpack.c.bf16 %v427_v26, %v426_v25 }
 0x20c   :  { %v434_v31 = vpack.c.bf16 %v425_v29, %v424_v28 }
 0x20e   :  { %910 = vmatprep.mubr.bf16.mxu0 %v434_v31 }
 0x20f   :  { %911 = vmatmul.mubr.bf16.gmra.mrb[28].mxu0 %v435_v30 }
 0x2ca   :  { %v900_v32 = vpop.f32.mrb[16].mxu0 }
 0x2cb   :  { %v534_v33 = vpop.f32.mrb[17].mxu0 }
 0x2cc   :  { %v901_v34 = vpop.f32.mrb[18].mxu0 }
 0x2cd   :  { %v598_v35 = vpack.c.bf16 %v901_v34, %v900_v32  ;;  %v537_v36 = vpop.f32.mrb[19].mxu0 }
 0x2ce   :  { %v597_v37 = vpack.c.bf16 %v537_v36, %v534_v33 }
 0x2d0   :  { %914 = vmatprep.subr.bf16.mxu1 %v597_v37 }
 0x2d1   :  { %915 = vmatpush3.bf16.msra.mxu1 %v597_v37 }
 0x2d2   :  { %v904_v38 = vpop.f32.mrb[20].mxu0  ;;  %916 = vmatprep.subr.bf16.mxu1 %v598_v35 }
 0x2d3   :  { %v550_v39 = vpop.f32.mrb[21].mxu0 }
 0x2d4   :  { %v905_v40 = vpop.f32.mrb[22].mxu0 }
 0x2d5   :  { %v600_v41 = vpack.c.bf16 %v905_v40, %v904_v38  ;;  %v553_v42 = vpop.f32.mrb[23].mxu0  ;;  %917 = vmatpush3.bf16.msra.mxu1 %v598_v35 }
 0x2d6   :  { %v599_v43 = vpack.c.bf16 %v553_v42, %v550_v39 }
 0x2d8   :  { %918 = vmatprep.subr.bf16.mxu1 %v599_v43 }
 0x2d9   :  { %919 = vmatpush3.bf16.msra.mxu1 %v599_v43 }
 0x2da   :  { %v908_v44 = vpop.f32.mrb[24].mxu0  ;;  %920 = vmatprep.subr.bf16.mxu1 %v600_v41 }
 0x2db   :  { %v566_v45 = vpop.f32.mrb[25].mxu0 }
 0x2dc   :  { %v909_v46 = vpop.f32.mrb[26].mxu0 }
 0x2dd   :  { %v602_v54 = vpack.c.bf16 %v909_v46, %v908_v44  ;;  %v569_v55 = vpop.f32.mrb[27].mxu0  ;;  %921 = vmatpush3.bf16.msra.mxu1 %v600_v41 }
 0x2de   :  { %v601_v56 = vpack.c.bf16 %v569_v55, %v566_v45 }
 0x2e0   :  { %922 = vmatprep.subr.bf16.mxu1 %v601_v56 }
 0x2e1   :  { %923 = vmatpush3.bf16.msra.mxu1 %v601_v56 }
 0x2e2   :  { %v912_v57 = vpop.f32.mrb[28].mxu0  ;;  %924 = vmatprep.subr.bf16.mxu1 %v602_v54 }
 0x2e3   :  { %v582_v58 = vpop.f32.mrb[29].mxu0 }
 0x2e4   :  { %v913_v59 = vpop.f32.mrb[30].mxu0 }
 0x2e5   :  { %v604_v60 = vpack.c.bf16 %v913_v59, %v912_v57  ;;  %v585_v61 = vpop.f32.mrb[31].mxu0  ;;  %925 = vmatpush3.bf16.msra.mxu1 %v602_v54 }
 0x2e6   :  { %v603_v62 = vpack.c.bf16 %v585_v61, %v582_v58 }
 0x2e8   :  { %926 = vmatprep.subr.bf16.mxu1 %v603_v62 }
 0x2e9   :  { %927 = vmatpush3.bf16.msra.mxu1 %v603_v62 }
 0x2ea   :  { %928 = vmatprep.subr.bf16.mxu1 %v604_v60 }
 0x2ed   :  { %929 = vmatpush3.bf16.msra.mxu1 %v604_v60 }
 0x2f0   :  { %931 = vmatmul.mubr.bf16.vlgmr.msra.gmra.mrb[16].mxu1 %v1078_v47 }
 0x2f1   :  { %934 = vmatprep.mubr.bf16.mxu1 %v1083_v48 }
 0x2f8   :  { %935 = vmatmul.mubr.bf16.gmra.mrb[20].mxu1 %v1090_v49 }
 0x2f9   :  { %938 = vmatprep.mubr.bf16.mxu1 %v1095_v50 }
 0x300   :  { %939 = vmatmul.mubr.bf16.gmra.mrb[24].mxu1 %v1102_v51 }
 0x301   :  { %942 = vmatprep.mubr.bf16.mxu1 %v1107_v52 }
 0x308   :  { %943 = vmatmul.mubr.bf16.gmra.mrb[28].mxu1 %v1114_v53 }
 0x3c3   :  { %v932_v63 = vpop.f32.mrb[16].mxu1 }
 0x3c4   :  { %704 = vst [vmem:[%s1183_s4 + $0x10] sm:$0xff] %v932_v63  ;;  %v639_v0 = vpop.f32.mrb[17].mxu1 }
 0x3c5   :  { %702 = vst [vmem:[%s1183_s4] sm:$0xff] %v639_v0  ;;  %v933_v47 = vpop.f32.mrb[18].mxu1 }
 0x3c6   :  { %705 = vst [vmem:[%s1183_s4 + $0x18] sm:$0xff] %v933_v47  ;;  %v642_v48 = vpop.f32.mrb[19].mxu1 }
 0x3c7   :  { %703 = vst [vmem:[%s1183_s4 + $0x8] sm:$0xff] %v642_v48 }
 0x3cb   :  { %v936_v49 = vpop.f32.mrb[20].mxu1 }
 0x3cc   :  { %708 = vst [vmem:[%s1183_s4 + $0x30] sm:$0xff] %v936_v49  ;;  %v655_v50 = vpop.f32.mrb[21].mxu1 }
 0x3cd   :  { %706 = vst [vmem:[%s1183_s4 + $0x20] sm:$0xff] %v655_v50  ;;  %v937_v51 = vpop.f32.mrb[22].mxu1 }
 0x3ce   :  { %709 = vst [vmem:[%s1183_s4 + $0x38] sm:$0xff] %v937_v51  ;;  %v658_v52 = vpop.f32.mrb[23].mxu1 }
 0x3cf   :  { %707 = vst [vmem:[%s1183_s4 + $0x28] sm:$0xff] %v658_v52 }
 0x3d3   :  { %v940_v53 = vpop.f32.mrb[24].mxu1 }
 0x3d4   :  { %712 = vst [vmem:[%s1183_s4 + $0x50] sm:$0xff] %v940_v53  ;;  %v671_v1 = vpop.f32.mrb[25].mxu1 }
 0x3d5   :  { %710 = vst [vmem:[%s1183_s4 + $0x40] sm:$0xff] %v671_v1  ;;  %v941_v2 = vpop.f32.mrb[26].mxu1 }
 0x3d6   :  { %713 = vst [vmem:[%s1183_s4 + $0x58] sm:$0xff] %v941_v2  ;;  %v674_v3 = vpop.f32.mrb[27].mxu1 }
 0x3d7   :  { %711 = vst [vmem:[%s1183_s4 + $0x48] sm:$0xff] %v674_v3 }
 0x3db   :  { %v944_v4 = vpop.f32.mrb[28].mxu1 }
 0x3dc   :  { %716 = vst [vmem:[%s1183_s4 + $0x70] sm:$0xff] %v944_v4  ;;  %v687_v5 = vpop.f32.mrb[29].mxu1 }
 0x3dd   :  { %714 = vst [vmem:[%s1183_s4 + $0x60] sm:$0xff] %v687_v5  ;;  %v945_v6 = vpop.f32.mrb[30].mxu1 }
 0x3de   :  { %717 = vst [vmem:[%s1183_s4 + $0x78] sm:$0xff] %v945_v6  ;;  %v690_v7 = vpop.f32.mrb[31].mxu1 }
 0x3df   :  { %715 = vst [vmem:[%s1183_s4 + $0x68] sm:$0xff] %v690_v7 }

</bundles_post_ra>
